<compile_context>
chip_gen: v7x
topology: tpu7x:2x2x1
jax: 0.10.0
libtpu: 0.0.40
codegen_flags: <defaults>
</compile_context>

<pallas_src>
import numpy as np
import jax
import jax.numpy as jnp
from jax import lax
from jax.experimental import pallas as pl
from jax.experimental.pallas import tpu as pltpu


def _rpn_head_kernel(p_ref, wc_ref, bc_ref, wh_ref, bh_ref, out_ref):
    # p_ref:   (1, 9*Cin, TN) bf16  strided-im2col patches for one (batch, lane-tile)
    # wc_ref:  (Cin, 9*Cin)   bf16  3x3 conv weight packed for left-multiplication
    # bc_ref:  (Cin, 1)       f32   conv bias (column -> lane broadcast)
    # wh_ref:  (Chp, Cin)     bf16  fused [cls ; bbox] 1x1 head weight (zero-padded rows)
    # bh_ref:  (Chp, 1)       f32   fused head bias
    # out_ref: (1, Chp, TN)   f32   fused head output (lane-dense)
    p = p_ref[0]                                                          # (9*Cin, TN)
    y = jnp.dot(wc_ref[...], p, preferred_element_type=jnp.float32)      # (Cin, TN) f32
    y = jnp.maximum(y + bc_ref[...], 0.0)                                 # bias + ReLU, f32
    heads = jnp.dot(wh_ref[...], y.astype(jnp.bfloat16),
                    preferred_element_type=jnp.float32)                   # (Chp, TN) f32
    out_ref[0] = heads + bh_ref[...]


def make_params(key, in_channels, num_anchors):
    k1, k2, k3 = jax.random.split(key, 3)
    std = 0.01
    return {
        "w_conv": std * jax.random.normal(k1, (in_channels, in_channels, 3, 3), jnp.float32),
        "b_conv": jnp.zeros((in_channels,), jnp.float32),
        "w_cls": std * jax.random.normal(k2, (num_anchors, in_channels, 1, 1), jnp.float32),
        "b_cls": jnp.zeros((num_anchors,), jnp.float32),
        "w_bbox": std * jax.random.normal(k3, (4 * num_anchors, in_channels, 1, 1), jnp.float32),
        "b_bbox": jnp.zeros((4 * num_anchors,), jnp.float32),
    }


def _pick_lane_tile(n_padded, k9, chp, vmem_budget_bytes=20 << 20):
    # n_padded is either < 128 (full-extent block) or a multiple of 128.
    if n_padded % 128 != 0:
        return n_padded
    # Double-buffered streaming cost per output lane: bf16 patch column + f32 output column.
    per_lane = 2 * (k9 * 2 + chp * 4)
    cap = max(128, min(1024, (vmem_budget_bytes // per_lane) // 128 * 128))
    t = 128
    while t * 2 <= min(n_padded, cap) and n_padded % (t * 2) == 0:
        t *= 2
    return t


def rpn_head_forward(x_nchw, params):
    B, Cin, H, W = x_nchw.shape
    A = params["w_cls"].shape[0]
    A4 = params["w_bbox"].shape[0]
    Ch = A + A4
    Chp = ((Ch + 7) // 8) * 8                      # pad fused head channels to sublane multiple
    # stride-2 1x1 conv output sizes (PyTorch: floor((H-1)/2)+1)
    Ho = (H - 1) // 2 + 1
    Wo = (W - 1) // 2 + 1
    N = Ho * Wo
    K9 = 9 * Cin

    # ---- glue: strided im2col at the stride-2 output positions (N on the lane axis) ----
    # Cast to bf16 first so the tap stack / patches write moves half the bytes.
    # TODO(synk): at very large Cin*H*W, form the 9 taps in-kernel from parity-split slabs to
    #             avoid materializing the (2.25x) patch tensor in HBM.
    xp = jnp.pad(x_nchw.astype(jnp.bfloat16), ((0, 0), (0, 0), (1, 1), (1, 1)))
    taps = []
    for kh in range(3):
        for kw in range(3):
            taps.append(xp[:, :, kh:kh + 2 * Ho - 1:2, kw:kw + 2 * Wo - 1:2])  # (B,Cin,Ho,Wo)
    patches = jnp.stack(taps, axis=1).reshape(B, K9, N)                        # (B, 9*Cin, N)
    Np = N if N % 128 == 0 or N < 128 else ((N + 127) // 128) * 128
    if Np != N:
        patches = jnp.pad(patches, ((0, 0), (0, 0), (0, Np - N)))
    TN = _pick_lane_tile(Np, K9, Chp)

    # ---- glue: weight repacking (bf16 matmul operands, f32 biases) ----
    # Column index of wc matches the tap-stack row index: (kh*3 + kw) * Cin + cin.
    wc = jnp.transpose(params["w_conv"], (0, 2, 3, 1)).reshape(Cin, K9).astype(jnp.bfloat16)
    bc = params["b_conv"].reshape(Cin, 1).astype(jnp.float32)
    w_heads = jnp.concatenate([params["w_cls"].reshape(A, Cin),
                               params["w_bbox"].reshape(A4, Cin)], axis=0)     # (5A, Cin)
    b_heads = jnp.concatenate([params["b_cls"], params["b_bbox"]], axis=0)     # (5A,)
    w_heads = jnp.pad(w_heads, ((0, Chp - Ch), (0, 0))).astype(jnp.bfloat16)   # (Chp, Cin)
    b_heads = jnp.pad(b_heads, (0, Chp - Ch)).reshape(Chp, 1).astype(jnp.float32)

    out = pl.pallas_call(
        _rpn_head_kernel,
        out_shape=jax.ShapeDtypeStruct((B, Chp, Np), jnp.float32),
        grid=(B, Np // TN),
        in_specs=[
            pl.BlockSpec((1, K9, TN), lambda b, n: (b, 0, n)),
            pl.BlockSpec((Cin, K9), lambda b, n: (0, 0)),
            pl.BlockSpec((Cin, 1), lambda b, n: (0, 0)),
            pl.BlockSpec((Chp, Cin), lambda b, n: (0, 0)),
            pl.BlockSpec((Chp, 1), lambda b, n: (0, 0)),
        ],
        out_specs=pl.BlockSpec((1, Chp, TN), lambda b, n: (b, 0, n)),
        compiler_params=pltpu.CompilerParams(
            dimension_semantics=("parallel", "parallel")),
    )(patches, wc, bc, w_heads, b_heads)

    # split fused heads + drop lane padding; layout is already NCHW after a reshape
    out = out[:, :, :N].reshape(B, Chp, Ho, Wo)
    logits = out[:, :A]
    bbox = out[:, A:Ch]
    return logits, bbox


def _reference_forward(x, params):
    dn = ("NCHW", "OIHW", "NCHW")
    hp = jax.lax.Precision.HIGHEST
    y = lax.conv_general_dilated(x, params["w_conv"], (1, 1), ((1, 1), (1, 1)),
                                 dimension_numbers=dn, precision=hp)
    y = jnp.maximum(y + params["b_conv"][None, :, None, None], 0.0)
    logits = lax.conv_general_dilated(y, params["w_cls"], (2, 2), "VALID",
                                      dimension_numbers=dn, precision=hp)
    logits = logits + params["b_cls"][None, :, None, None]
    bbox = lax.conv_general_dilated(y, params["w_bbox"], (2, 2), "VALID",
                                    dimension_numbers=dn, precision=hp)
    bbox = bbox + params["b_bbox"][None, :, None, None]
    return logits, bbox


if __name__ == "__main__":
    B, Cin, H, W, A = 2, 16, 32, 32, 3
    key = jax.random.PRNGKey(0)
    kx, kp = jax.random.split(key)
    x = jax.random.normal(kx, (B, Cin, H, W), jnp.float32)
    params = make_params(kp, Cin, A)

    logits, bbox = jax.jit(rpn_head_forward)(x, params)
    jax.block_until_ready((logits, bbox))

    ref_logits, ref_bbox = _reference_forward(x, params)
    # bf16 matmul operands (f32 accumulation) vs f32 HIGHEST reference -> loosened tolerance.
    np.testing.assert_allclose(np.asarray(logits), np.asarray(ref_logits),
                               rtol=2e-2, atol=1e-3)
    np.testing.assert_allclose(np.asarray(bbox), np.asarray(ref_bbox),
                               rtol=2e-2, atol=1e-3)

    print("KERNEL_OK")
</pallas_src>

<mosaic_0001>
module attributes {stable_mosaic.version = 11 : i64} {
  func.func @_rpn_head_kernel(%arg0: i32, %arg1: i32, %arg2: memref<1x144x256xbf16, #tpu.memory_space<vmem>>, %arg3: memref<16x144xbf16, #tpu.memory_space<vmem>>, %arg4: memref<16x1xf32, #tpu.memory_space<vmem>>, %arg5: memref<16x16xbf16, #tpu.memory_space<vmem>>, %arg6: memref<16x1xf32, #tpu.memory_space<vmem>>, %arg7: memref<1x16x256xf32, #tpu.memory_space<vmem>>) attributes {dimension_semantics = [#tpu.dimension_semantics<parallel>, #tpu.dimension_semantics<parallel>], iteration_bounds = array<i64: 2, 1>, scalar_prefetch = 0 : i64, scratch_operands = 0 : i64, tpu.core_type = #tpu.core_type<tc>, window_params = [{transform_indices = @transform_0, window_bounds = array<i64: 1, 144, 256>}, {pipeline_mode = #tpu.pipeline_mode<synchronous>, transform_indices = @transform_1, window_bounds = array<i64: 16, 144>}, {pipeline_mode = #tpu.pipeline_mode<synchronous>, transform_indices = @transform_2, window_bounds = array<i64: 16, 1>}, {pipeline_mode = #tpu.pipeline_mode<synchronous>, transform_indices = @transform_3, window_bounds = array<i64: 16, 16>}, {pipeline_mode = #tpu.pipeline_mode<synchronous>, transform_indices = @transform_4, window_bounds = array<i64: 16, 1>}, {transform_indices = @transform_5, window_bounds = array<i64: 1, 16, 256>}]} {
    %c0 = arith.constant 0 : index
    %c0_0 = arith.constant 0 : index
    %c0_1 = arith.constant 0 : index
    %0 = vector.load %arg2[%c0, %c0_0, %c0_1] : memref<1x144x256xbf16, #tpu.memory_space<vmem>>, vector<1x144x256xbf16>
    %1 = vector.shape_cast %0 : vector<1x144x256xbf16> to vector<144x256xbf16>
    %c0_2 = arith.constant 0 : index
    %c0_3 = arith.constant 0 : index
    %2 = vector.load %arg3[%c0_2, %c0_3] : memref<16x144xbf16, #tpu.memory_space<vmem>>, vector<16x144xbf16>
    %cst = arith.constant dense<0.000000e+00> : vector<16x256xf32>
    %3 = tpu.matmul %2, %1, %cst {dimension_numbers = #tpu.dot_dimension_numbers<[1], [0], [0], [1], [0, 0, 1, 1], [], []>} : vector<16x144xbf16>, vector<144x256xbf16>, vector<16x256xf32> -> vector<16x256xf32>
    %c0_4 = arith.constant 0 : index
    %c0_5 = arith.constant 0 : index
    %4 = vector.load %arg4[%c0_4, %c0_5] : memref<16x1xf32, #tpu.memory_space<vmem>>, vector<16x1xf32>
    %5 = vector.broadcast %4 : vector<16x1xf32> to vector<16x256xf32>
    %6 = arith.addf %3, %5 : vector<16x256xf32>
    %cst_6 = arith.constant 0.000000e+00 : f32
    %7 = vector.broadcast %cst_6 : f32 to vector<16x256xf32>
    %8 = arith.maximumf %6, %7 : vector<16x256xf32>
    %c0_7 = arith.constant 0 : index
    %c0_8 = arith.constant 0 : index
    %9 = vector.load %arg5[%c0_7, %c0_8] : memref<16x16xbf16, #tpu.memory_space<vmem>>, vector<16x16xbf16>
    %10 = arith.truncf %8 : vector<16x256xf32> to vector<16x256xbf16>
    %cst_9 = arith.constant dense<0.000000e+00> : vector<16x256xf32>
    %11 = tpu.matmul %9, %10, %cst_9 {dimension_numbers = #tpu.dot_dimension_numbers<[1], [0], [0], [1], [0, 0, 1, 1], [], []>} : vector<16x16xbf16>, vector<16x256xbf16>, vector<16x256xf32> -> vector<16x256xf32>
    %c0_10 = arith.constant 0 : index
    %c0_11 = arith.constant 0 : index
    %12 = vector.load %arg6[%c0_10, %c0_11] : memref<16x1xf32, #tpu.memory_space<vmem>>, vector<16x1xf32>
    %13 = vector.broadcast %12 : vector<16x1xf32> to vector<16x256xf32>
    %14 = arith.addf %11, %13 : vector<16x256xf32>
    %c0_12 = arith.constant 0 : index
    %c0_13 = arith.constant 0 : index
    %c0_14 = arith.constant 0 : index
    %15 = vector.load %arg7[%c0_12, %c0_13, %c0_14] : memref<1x16x256xf32, #tpu.memory_space<vmem>>, vector<1x16x256xf32>
    %16 = vector.shape_cast %15 : vector<1x16x256xf32> to vector<16x256xf32>
    %17 = vector.shape_cast %14 : vector<16x256xf32> to vector<1x16x256xf32>
    tpu.vector_store %arg7[%c0_12, %c0_13, %c0_14], %17 {strides = array<i32>} : memref<1x16x256xf32, #tpu.memory_space<vmem>>, vector<1x16x256xf32>,
    return
  }
  func.func @transform_0(%arg0: i32, %arg1: i32) -> (i32, i32, i32) {
    %c0_i32 = arith.constant 0 : i32
    %c0_i32_0 = arith.constant 0 : i32
    return %arg0, %c0_i32, %arg1 : i32, i32, i32
  }
  func.func @transform_1(%arg0: i32, %arg1: i32) -> (i32, i32) {
    %c0_i32 = arith.constant 0 : i32
    %c0_i32_0 = arith.constant 0 : i32
    %c0_i32_1 = arith.constant 0 : i32
    return %c0_i32, %c0_i32_0 : i32, i32
  }
  func.func @transform_2(%arg0: i32, %arg1: i32) -> (i32, i32) {
    %c0_i32 = arith.constant 0 : i32
    %c0_i32_0 = arith.constant 0 : i32
    %c0_i32_1 = arith.constant 0 : i32
    return %c0_i32, %c0_i32_0 : i32, i32
  }
  func.func @transform_3(%arg0: i32, %arg1: i32) -> (i32, i32) {
    %c0_i32 = arith.constant 0 : i32
    %c0_i32_0 = arith.constant 0 : i32
    %c0_i32_1 = arith.constant 0 : i32
    return %c0_i32, %c0_i32_0 : i32, i32
  }
  func.func @transform_4(%arg0: i32, %arg1: i32) -> (i32, i32) {
    %c0_i32 = arith.constant 0 : i32
    %c0_i32_0 = arith.constant 0 : i32
    %c0_i32_1 = arith.constant 0 : i32
    return %c0_i32, %c0_i32_0 : i32, i32
  }
  func.func @transform_5(%arg0: i32, %arg1: i32) -> (i32, i32, i32) {
    %c0_i32 = arith.constant 0 : i32
    %c0_i32_0 = arith.constant 0 : i32
    return %arg0, %c0_i32, %arg1 : i32, i32, i32
  }
}

</mosaic_0001>

<bundles_post_ra>
// kernel: rpn_head_forward.1
= control target key start
LH: loop header
LB: loop body
LE: loop exit
PB: predicated region body
PF: predicated region fallthrough
CT: control target
= control target key end

     0   :  { %s753_s18 = smov 0   ;;  %s755_s19 = smov 0   ;;  %s833_s0 = inlined_call_operand.vmem [shape: bf16[2,144,256], index: 0, kind: input, shape index: {}]   ;;  %s834_s1 = inlined_call_operand.vmem [shape: bf16[16,144], index: 1, kind: input, shape index: {}]   ;;  %s835_s2 = inlined_call_operand.vmem [shape: f32[16,1], index: 2, kind: input, shape index: {}]   ;;  %s836_s3 = inlined_call_operand.vmem [shape: bf16[16,16], index: 3, kind: input, shape index: {}]   ;;  %s837_s4 = inlined_call_operand.vmem [shape: f32[16,1], index: 4, kind: input, shape index: {}]   ;;  %s838_s5 = inlined_call_operand.vmem [shape: f32[2,16,256], index: 5, kind: output, shape index: {}]  }
   0x1   :  { %s757_s20 = smov 0  }
   0x2 LB: > { %s27_s21 = sadd.s32 1, %s716_s19  ;;  %p609_p0 = scmp.ge.s32.totalorder %s720_s20, 1  ;;  %s720_s20 = sphi %s757_s20, %s15_s20   ;;  %s716_s19 = sphi %s755_s19, %s840_s19   ;;  %s712_s18 = sphi %s753_s18, %s839_s18  }
   0x3   : > { %p29_p1 = scmp.ge.s32.totalorder %s27_s21, 2  ;;  %p208_p2 = scmp.lt.s32.totalorder %s720_s20, 3 }
   0x5   : > { %s842_s21 = smov (%p29_p1, %s27_s21), 0  ;;  %p209_p3 = pnand %p609_p0, %p208_p2 }
   0x6   : > { %p245_p4 = scmp.lt.s32.totalorder (!%p209_p3), %s712_s18, 1  ;;  %vm396_vm0 = vcmask (!%p209_p3), 130048   ;;  %v696_v0 = vld [vmem:[%s834_s1 + $0x4] ss:$8 sps:$4 sm:$0xff] (!%p209_p3)   ;;  %v722_v2 = vmov (!%p209_p3), 0  }
   0x7   : > { %212 = sbr.rel (%p209_p3) target bundleno = 498 (0x1f2), region = 40  ;;  %v285_v1 = vld [vmem:[%s835_s2] sm:$0xff] (!%p209_p3)  ;;  %665 = vset.pattern.permute.xlu0 (!%p209_p3), %v722_v2  ;;  %503 = vmatprep.mubr.bf16.mxu1 (!%p209_p3), %v722_v2  ;;  %v286_v3 = vld [vmem:[%s835_s2 + $0x8] sm:$0xff] (!%p209_p3) }
   0x8   : > { %633 = vmatprep.mubr.msk.bf16.mxu0 (!%p209_p3), %vm396_vm0, %v696_v0  ;;  %289 = vperm.xlu0 (!%p209_p3), %665, %v285_v1   ;;  %v694_v22 = vld [vmem:[%s834_s1] ss:$8 sps:$4 sm:$0xff] (!%p209_p3)  }
   0x9   : > { %666 = vset.pattern.permute.xlu1 (!%p209_p3), %v722_v2  ;;  %v451_v23 = vld [vmem:[%s837_s4] sm:$0xff] (!%p209_p3)  ;;  %v452_v24 = vld [vmem:[%s837_s4 + $0x8] sm:$0xff] (!%p209_p3) }
   0xa   : > { %455 = vperm.xlu1 (!%p209_p3), %666, %v451_v23   ;;  %v697_v41 = vld [vmem:[%s836_s3] sm:$0xff] (!%p209_p3)  }
   0xc   : > { %294 = vperm.xlu0 (!%p209_p3), %665, %v286_v3  }
   0xe   : > { %s844_s18 = smov (!%p245_p4, %s712_s18), 1  ;;  %460 = vperm.xlu1 %666, %v452_v24  }
   0xf   : > { %s639_s26 = smul.u32 144, %s844_s18  ;;  %s638_s15 = sshll.u32 %s844_s18, 5 }
  0x10   : > { %s262_s22 = scalar_lea.vmem %s838_s5, %s638_s15 }
  0x11   : > { %s787_s6 = scalar_lea.vmem %s833_s0, %s639_s26 }
  0x12   : > { %v667_v4 = vld [vmem:[%s787_s6 + $0x4] ss:$8 sps:$4 sm:$0xff]   ;;  %v669_v5 = vld [vmem:[%s787_s6] ss:$8 sps:$4 sm:$0xff]   ;;  %v670_v6 = vld [vmem:[%s787_s6 + $0x14] ss:$8 sps:$4 sm:$0xff]  }
  0x13   : > { %400 = vmatprep.subr.bf16.mxu0 %v667_v4  ;;  %v672_v7 = vld [vmem:[%s787_s6 + $0x10] ss:$8 sps:$4 sm:$0xff]   ;;  %v673_v8 = vld [vmem:[%s787_s6 + $0x24] ss:$8 sps:$4 sm:$0xff]   ;;  %v675_v9 = vld [vmem:[%s787_s6 + $0x20] ss:$8 sps:$4 sm:$0xff]  }
  0x14   : > { %401 = vmatpush1.bf16.msra.mxu0 %v669_v5  ;;  %v676_v10 = vld [vmem:[%s787_s6 + $0x34] ss:$8 sps:$4 sm:$0xff]   ;;  %v678_v11 = vld [vmem:[%s787_s6 + $0x30] ss:$8 sps:$4 sm:$0xff]   ;;  %v679_v12 = vld [vmem:[%s787_s6 + $0x44] ss:$8 sps:$4 sm:$0xff]  }
  0x15   : > { %402 = vmatprep.subr.bf16.mxu0 %v670_v6  ;;  %v681_v13 = vld [vmem:[%s787_s6 + $0x40] ss:$8 sps:$4 sm:$0xff]   ;;  %v682_v14 = vld [vmem:[%s787_s6 + $0x54] ss:$8 sps:$4 sm:$0xff]   ;;  %v684_v15 = vld [vmem:[%s787_s6 + $0x50] ss:$8 sps:$4 sm:$0xff]  }
  0x16   : > { %v685_v16 = vld [vmem:[%s787_s6 + $0x64] ss:$8 sps:$4 sm:$0xff]   ;;  %v687_v17 = vld [vmem:[%s787_s6 + $0x60] ss:$8 sps:$4 sm:$0xff]   ;;  %v688_v18 = vld [vmem:[%s787_s6 + $0x74] ss:$8 sps:$4 sm:$0xff]  }
  0x17   : > { %v690_v19 = vld [vmem:[%s787_s6 + $0x70] ss:$8 sps:$4 sm:$0xff]   ;;  %v691_v20 = vld [vmem:[%s787_s6 + $0x84] ss:$8 sps:$4 sm:$0xff]   ;;  %v693_v21 = vld [vmem:[%s787_s6 + $0x80] ss:$8 sps:$4 sm:$0xff]  }
  0x18   : > { %403 = vmatpush1.bf16.msra.mxu0 %v672_v7 }
  0x19   : > { %404 = vmatprep.subr.bf16.mxu0 %v673_v8 }
  0x1c   : > { %405 = vmatpush1.bf16.msra.mxu0 %v675_v9 }
  0x1d   : > { %406 = vmatprep.subr.bf16.mxu0 %v676_v10 }
  0x20   : > { %407 = vmatpush1.bf16.msra.mxu0 %v678_v11 }
  0x21   : > { %408 = vmatprep.subr.bf16.mxu0 %v679_v12 }
  0x24   : > { %409 = vmatpush1.bf16.msra.mxu0 %v681_v13 }
  0x25   : > { %410 = vmatprep.subr.bf16.mxu0 %v682_v14 }
  0x28   : > { %411 = vmatpush1.bf16.msra.mxu0 %v684_v15 }
  0x29   : > { %412 = vmatprep.subr.bf16.mxu0 %v685_v16 }
  0x2c   : > { %413 = vmatpush1.bf16.msra.mxu0 %v687_v17 }
  0x2d   : > { %414 = vmatprep.subr.bf16.mxu0 %v688_v18 }
  0x30   : > { %415 = vmatpush1.bf16.msra.mxu0 %v690_v19 }
  0x31   : > { %416 = vmatprep.subr.bf16.mxu0 %v691_v20 }
  0x34   : > { %417 = vmatpush1.bf16.msra.mxu0 %v693_v21 }
  0x37   : > { %433 = vmatmul.mubr.bf16.vlgmr.msra.gmra.mrb[0].mxu0 %v694_v22 }
  0x87   : > { %v290_v25 = vpop.permute.xlu0 %289 }
  0x89   : > { %v456_v42 = vpop.permute.xlu1 %455 }
  0x8b   : > { %v295_v29 = vpop.permute.xlu0 %294 }
  0x8d   : > { %v461_v46 = vpop.permute.xlu1 %460 }
 0x10a   : > { %v434_v26 = vpop.f32.mrb[0].mxu0 }
 0x10b   : > { %v435_v27 = vadd.f32 %v434_v26, %v290_v25  ;;  %v436_v28 = vpop.f32.mrb[1].mxu0 }
 0x10c   : > { %v437_v30 = vadd.f32 %v436_v28, %v290_v25  ;;  %v438_v31 = vpop.f32.mrb[2].mxu0 }
 0x10d   : > { %v439_v32 = vadd.f32 %v438_v31, %v295_v29  ;;  %v440_v33 = vpop.f32.mrb[3].mxu0  ;;  %v443_v35 = vmax.f32 %v435_v27, 0.0 }
 0x10e   : > { %v441_v34 = vadd.f32 %v440_v33, %v295_v29  ;;  %v444_v37 = vmax.f32 %v437_v30, 0.0 }
 0x10f   : > { %v445_v36 = vmax.f32 %v439_v32, 0.0 }
 0x110   : > { %v446_v38 = vmax.f32 %v441_v34, 0.0 }
 0x111   : > { %v449_v39 = vpack.c.bf16 %v445_v36, %v443_v35 }
 0x112   : > { %v450_v40 = vpack.c.bf16 %v446_v38, %v444_v37 }
 0x114   : > { %471 = vmatprep.subr.bf16.mxu1 %v450_v40 }
 0x115   : > { %472 = vmatpush1.bf16.msra.mxu1 %v449_v39 }
 0x118   : > { %635 = vmatmul.mubr.msk.bf16.vlgmr.msra.gmra.mrb[0].mxu1 %vm396_vm0, %v697_v41 }
 0x1eb   : > { %v505_v43 = vpop.f32.mrb[0].mxu1 }
 0x1ec   : > { %v506_v44 = vadd.f32 %v505_v43, %v456_v42  ;;  %v507_v45 = vpop.f32.mrb[1].mxu1 }
 0x1ed   : > { %v508_v47 = vadd.f32 %v507_v45, %v456_v42  ;;  %v509_v48 = vpop.f32.mrb[2].mxu1 }
 0x1ee   : > { %514 = vst [vmem:[%s262_s22] sm:$0xff] %v506_v44  ;;  %v510_v49 = vadd.f32 %v509_v48, %v461_v46  ;;  %v511_v50 = vpop.f32.mrb[3].mxu1 }
 0x1ef   : > { %515 = vst [vmem:[%s262_s22 + $0x8] sm:$0xff] %v508_v47  ;;  %v512_v51 = vadd.f32 %v511_v50, %v461_v46 }
 0x1f0   : > { %516 = vst [vmem:[%s262_s22 + $0x10] sm:$0xff] %v510_v49 }
 0x1f1   : > { %517 = vst [vmem:[%s262_s22 + $0x18] sm:$0xff] %v512_v51 }
 0x1f2 PF: > { %s15_s20 = sadd.s32 1, %s720_s20   ;;  %s839_s18 = smov %s716_s19 }
 0x1f3   : > { %p12_p5 = scmp.ge.s32.totalorder %s15_s20, 4   ;;  %s840_s19 = smov %s842_s21 }
 0x1f5   :  { %14 = sbr.rel (!%p12_p5) target bundleno = 2 (0x2), region = 70 }

</bundles_post_ra>
